<compile_context>
chip_gen: v7x
topology: tpu7x:2x2x1
jax: 0.10.0
libtpu: 0.0.40
codegen_flags: <defaults>
</compile_context>

<pallas_src>
import functools

import jax
import jax.numpy as jnp
from jax.experimental import pallas as pl
from jax.experimental.pallas import tpu as pltpu

_LANE = 1024            # lane-dense last dim (multiple of 128)
_MAX_TILE_ROWS = 1024   # 1024*1024 f32 = 4 MiB per pipelined buffer
_VMEM_LIMIT = 32 << 20  # safe scoped-VMEM limit on v5e/v6e/v7x


def _uniform_bits_u32(shape):
    """Hardware PRNG bits, reinterpreted as uint32."""
    bits = pltpu.prng_random_bits(shape)
    if bits.dtype != jnp.uint32:
        bits = pltpu.bitcast(bits, jnp.uint32)
    return bits


def _dropout_kernel_hw(seed_ref, x_ref, o_ref, *, threshold, scale):
    # Seed once per grid step; mixing in program_id gives every tile (and
    # every TensorCore under megacore sharding) an independent stream.
    pltpu.prng_seed(seed_ref[0], pl.program_id(0))
    keep = _uniform_bits_u32(x_ref.shape) < jnp.uint32(threshold)
    xf = x_ref[...].astype(jnp.float32)
    o_ref[...] = jnp.where(keep, xf * jnp.float32(scale),
                           jnp.float32(0.0)).astype(o_ref.dtype)


def _dropout_kernel_sw(seed_ref, x_ref, o_ref, *, threshold, scale,
                       tile_rows, lane_shift):
    # Fallback: counter-based PRNG (murmur3 fmix32 of global element index
    # xor a premixed seed scalar), full uint32 threshold compare.
    shape = x_ref.shape
    row = jax.lax.broadcasted_iota(jnp.int32, shape, 0).astype(jnp.uint32)
    col = jax.lax.broadcasted_iota(jnp.int32, shape, 1).astype(jnp.uint32)
    row_off = (pl.program_id(0) * tile_rows).astype(jnp.uint32)
    gidx = ((row + row_off) << jnp.uint32(lane_shift)) | col
    seed_mix = seed_ref[0].astype(jnp.uint32) * jnp.uint32(0x9E3779B9)
    h = gidx ^ seed_mix
    h = h ^ (h >> jnp.uint32(16))
    h = h * jnp.uint32(0x85EBCA6B)
    h = h ^ (h >> jnp.uint32(13))
    h = h * jnp.uint32(0xC2B2AE35)
    h = h ^ (h >> jnp.uint32(16))
    keep = h < jnp.uint32(threshold)
    xf = x_ref[...].astype(jnp.float32)
    o_ref[...] = jnp.where(keep, xf * jnp.float32(scale),
                           jnp.float32(0.0)).astype(o_ref.dtype)


def _hw_prng_probe_kernel(o_ref):
    pltpu.prng_seed(jnp.int32(0))
    bits = pltpu.prng_random_bits(o_ref.shape)
    if bits.dtype != jnp.int32:
        bits = pltpu.bitcast(bits, jnp.int32)
    o_ref[...] = bits


@functools.lru_cache(maxsize=1)
def _hw_prng_supported() -> bool:
    """One-time check that the TPU hardware PRNG lowers on this toolchain."""
    try:
        out = pl.pallas_call(
            _hw_prng_probe_kernel,
            out_shape=jax.ShapeDtypeStruct((8, 128), jnp.int32),
        )()
        jax.block_until_ready(out)
        return True
    except Exception:
        return False


def _pick_divisor_tile(rows: int, max_tile: int) -> int:
    """Largest multiple of 8 that divides `rows` and is <= max_tile."""
    t = min(rows, max_tile)
    t -= t % 8
    t = max(t, 8)
    while t > 8 and rows % t != 0:
        t -= 8
    return t


def dropout(x, p=0.5, *, training=True, seed=0):
    """Pallas TPU implementation of the custom Dropout module's forward pass."""
    if not training or p <= 0.0:
        return x
    if p >= 1.0:
        return jnp.zeros_like(x)

    orig_shape = x.shape
    orig_dtype = x.dtype
    total = int(x.size)
    if total == 0:
        return x

    lane = _LANE
    rows = -(-total // lane)          # ceil-div to lane-dense rows
    rows = -(-rows // 8) * 8          # sublane-align rows

    # Cap the tile so mid/large inputs get >= 2 grid steps (v7x megacore).
    max_tile = min(_MAX_TILE_ROWS, max(8, (rows // 2) // 8 * 8))

    needs_pad = rows * lane != total
    if needs_pad:
        # A pad/slice pass is unavoidable; favor big tiles (few grid steps).
        tile_rows = min(max_tile, rows)
        rows = -(-rows // tile_rows) * tile_rows
    else:
        # Exact fit: keep it that way (no pad / no output slice) by choosing
        # a tile that divides the row count.
        tile_rows = _pick_divisor_tile(rows, max_tile)
    padded = rows * lane

    xf = jnp.ravel(x)
    if needs_pad:
        xf = jnp.pad(xf, (0, padded - total))
    x2d = xf.reshape(rows, lane)

    keep_prob = 1.0 - float(p)
    threshold = int(round(keep_prob * 4294967296.0))
    threshold = max(1, min(threshold, 4294967295))
    scale = 1.0 / keep_prob

    # Seed may be a Python int or a traced int array (no retrace per step).
    seed_arr = jnp.asarray(seed, dtype=jnp.int32).reshape((1,))

    if _hw_prng_supported():
        kernel = functools.partial(_dropout_kernel_hw, threshold=threshold,
                                   scale=scale)
    else:
        # TODO(synk): amortize the hash (2x16-bit fields per uint32) if this
        # fallback ever becomes the hot path on v7x.
        kernel = functools.partial(_dropout_kernel_sw, threshold=threshold,
                                   scale=scale, tile_rows=tile_rows,
                                   lane_shift=lane.bit_length() - 1)

    out2d = pl.pallas_call(
        kernel,
        out_shape=jax.ShapeDtypeStruct((rows, lane), orig_dtype),
        grid_spec=pltpu.PrefetchScalarGridSpec(
            num_scalar_prefetch=1,
            grid=(rows // tile_rows,),
            in_specs=[pl.BlockSpec((tile_rows, lane), lambda i, s: (i, 0))],
            out_specs=pl.BlockSpec((tile_rows, lane), lambda i, s: (i, 0)),
        ),
        compiler_params=pltpu.CompilerParams(
            dimension_semantics=("parallel",),
            vmem_limit_bytes=_VMEM_LIMIT,
        ),
    )(seed_arr, x2d)

    if needs_pad:
        return out2d.reshape(padded)[:total].reshape(orig_shape)
    return out2d.reshape(orig_shape)


if __name__ == "__main__":
    key = jax.random.PRNGKey(0)
    # NCHW input, small shapes consistent with a CNN feature map.
    x = jax.random.normal(key, (2, 4, 16, 16), dtype=jnp.float32)

    p = 0.5
    y = dropout(x, p=p, training=True, seed=0)
    y = jax.block_until_ready(y)

    # Sanity checks on dropout semantics:
    assert y.shape == x.shape and y.dtype == x.dtype
    scale = 1.0 / (1.0 - p)
    is_zero = jnp.isclose(y, 0.0)
    is_scaled = jnp.isclose(y, x * scale, rtol=1e-5, atol=1e-6)
    assert bool(jnp.all(is_zero | is_scaled))
    keep_frac = float(jnp.mean(is_scaled.astype(jnp.float32)))
    assert 0.25 < keep_frac < 0.75, keep_frac

    # Different seeds (traced array seed) give a different mask.
    y2 = dropout(x, p=p, training=True, seed=jnp.asarray([1], dtype=jnp.int32))
    y2 = jax.block_until_ready(y2)
    assert bool(jnp.any(y2 != y))

    # Eval mode is identity; p=1 drops everything.
    y_eval = dropout(x, p=p, training=False)
    assert bool(jnp.all(y_eval == x))
    assert bool(jnp.all(dropout(x, p=1.0, training=True) == 0.0))

    print("KERNEL_OK")
</pallas_src>

<mosaic_0001>
module attributes {stable_mosaic.version = 11 : i64} {
  func.func @_dropout_kernel_sw(%arg0: i32, %arg1: memref<1xi32, #tpu.memory_space<smem>>, %arg2: memref<8x1024xf32, #tpu.memory_space<vmem>>, %arg3: memref<8x1024xf32, #tpu.memory_space<vmem>>) attributes {dimension_semantics = [#tpu.dimension_semantics<parallel>], iteration_bounds = array<i64: 1>, scalar_prefetch = 1 : i64, scratch_operands = 0 : i64, tpu.core_type = #tpu.core_type<tc>, window_params = [{transform_indices = @transform_0, window_bounds = array<i64: 8, 1024>}, {transform_indices = @transform_1, window_bounds = array<i64: 8, 1024>}]} {
    %0 = tpu.iota {dimensions = array<i32: 0>} : vector<8x1024xi32>
    %1 = tpu.iota {dimensions = array<i32: 1>} : vector<8x1024xi32>
    %c8_i32 = arith.constant 8 : i32
    %2 = arith.muli %arg0, %c8_i32 : i32
    %3 = vector.broadcast %2 : i32 to vector<8x1024xi32>
    %4 = arith.addi %0, %3 : vector<8x1024xi32>
    %c10_i32 = arith.constant 10 : i32
    %5 = vector.broadcast %c10_i32 : i32 to vector<8x1024xi32>
    %6 = arith.shli %4, %5 : vector<8x1024xi32>
    %7 = arith.ori %6, %1 : vector<8x1024xi32>
    %c0 = arith.constant 0 : index
    %8 = memref.load %arg1[%c0] : memref<1xi32, #tpu.memory_space<smem>>
    %c-1640531527_i32 = arith.constant -1640531527 : i32
    %9 = arith.muli %8, %c-1640531527_i32 : i32
    %10 = vector.broadcast %9 : i32 to vector<8x1024xi32>
    %11 = arith.xori %7, %10 : vector<8x1024xi32>
    %c16_i32 = arith.constant 16 : i32
    %12 = vector.broadcast %c16_i32 : i32 to vector<8x1024xi32>
    %13 = arith.shrui %11, %12 : vector<8x1024xi32>
    %14 = arith.xori %11, %13 : vector<8x1024xi32>
    %c-2048144789_i32 = arith.constant -2048144789 : i32
    %15 = vector.broadcast %c-2048144789_i32 : i32 to vector<8x1024xi32>
    %16 = arith.muli %14, %15 : vector<8x1024xi32>
    %c13_i32 = arith.constant 13 : i32
    %17 = vector.broadcast %c13_i32 : i32 to vector<8x1024xi32>
    %18 = arith.shrui %16, %17 : vector<8x1024xi32>
    %19 = arith.xori %16, %18 : vector<8x1024xi32>
    %c-1028477387_i32 = arith.constant -1028477387 : i32
    %20 = vector.broadcast %c-1028477387_i32 : i32 to vector<8x1024xi32>
    %21 = arith.muli %19, %20 : vector<8x1024xi32>
    %c16_i32_0 = arith.constant 16 : i32
    %22 = vector.broadcast %c16_i32_0 : i32 to vector<8x1024xi32>
    %23 = arith.shrui %21, %22 : vector<8x1024xi32>
    %24 = arith.xori %21, %23 : vector<8x1024xi32>
    %c-2147483648_i32 = arith.constant -2147483648 : i32
    %25 = vector.broadcast %c-2147483648_i32 : i32 to vector<8x1024xi32>
    %26 = arith.cmpi ult, %24, %25 : vector<8x1024xi32>
    %c0_1 = arith.constant 0 : index
    %c0_2 = arith.constant 0 : index
    %27 = vector.load %arg2[%c0_1, %c0_2] : memref<8x1024xf32, #tpu.memory_space<vmem>>, vector<8x1024xf32>
    %cst = arith.constant 2.000000e+00 : f32
    %28 = vector.broadcast %cst : f32 to vector<8x1024xf32>
    %29 = arith.mulf %27, %28 : vector<8x1024xf32>
    %cst_3 = arith.constant 0.000000e+00 : f32
    %30 = vector.broadcast %cst_3 : f32 to vector<8x1024xf32>
    %31 = arith.select %26, %29, %30 : vector<8x1024xi1>, vector<8x1024xf32>
    %c0_4 = arith.constant 0 : index
    %c0_5 = arith.constant 0 : index
    %32 = vector.load %arg3[%c0_4, %c0_5] : memref<8x1024xf32, #tpu.memory_space<vmem>>, vector<8x1024xf32>
    tpu.vector_store %arg3[%c0_4, %c0_5], %31 {strides = array<i32>} : memref<8x1024xf32, #tpu.memory_space<vmem>>, vector<8x1024xf32>,
    return
  }
  func.func @transform_0(%arg0: i32, %arg1: memref<1xi32, #tpu.memory_space<smem>>) -> (i32, i32) {
    %c0_i32 = arith.constant 0 : i32
    %c0_i32_0 = arith.constant 0 : i32
    return %arg0, %c0_i32 : i32, i32
  }
  func.func @transform_1(%arg0: i32, %arg1: memref<1xi32, #tpu.memory_space<smem>>) -> (i32, i32) {
    %c0_i32 = arith.constant 0 : i32
    %c0_i32_0 = arith.constant 0 : i32
    return %arg0, %c0_i32 : i32, i32
  }
}

</mosaic_0001>

<bundles_post_ra>
// kernel: tpu_custom_call.1
= control target key start
LH: loop header
LB: loop body
LE: loop exit
PB: predicated region body
PF: predicated region fallthrough
CT: control target
= control target key end

     0   :  { %8 = vsyncpa [#allocation5], 0  ;;  %s288_s0 = inlined_call_operand.<no memory space> [shape: s32[1], index: 0, kind: input, shape index: {}]   ;;  %s289_s1 = inlined_call_operand.hbm [shape: f32[8,1024], index: 1, kind: input, shape index: {}]   ;;  %s290_s2 = inlined_call_operand.hbm [shape: f32[8,1024], index: 2, kind: output, shape index: {}]  }
   0x1   :  { %9 = vsyncpa [#allocation6], 0  ;;  %s226_s9 = smov [#allocation4]   ;;  %s178_s13 = scalar_lea.hbm %s289_s1, 1024 }
   0x2   :  { %s16_s10 = sshll.u32 %s226_s9, 4  ;;  %p179_p0 = scmp.ne.s32.totalorder %s289_s1, %s178_s13  ;;  %s17_s10 = int_to_ptr.vmem [resolvable:$true] %s16_s10 }
   0x3   :  { %p182_p1 = scmp.lt.u32.totalorder %s178_s13, %s289_s1 }
   0x5   :  { %p184_p2 = pnand %p182_p1, %p179_p0 }
   0x7   :  { %187 = shalt.err (!%p184_p2)
}
   0x8   :  { %s188_s18 = scalar_lea.vmem %s17_s10, 1024  ;;  %p193_p4 = scmp.lt.s32.totalorder %s17_s10, %s17_s10 }
   0x9   :  { %p189_p3 = scmp.ne.s32.totalorder %s17_s10, %s188_s18  ;;  %p194_p5 = scmp.lt.s32.totalorder %s188_s18, %s188_s18 }
   0xb   :  { %p195_p6 = por %p194_p5, %p193_p4 }
   0xd   :  { %p196_p7 = pnand %p195_p6, %p189_p3 }
   0xf   :  { %199 = shalt.err (!%p196_p7)
}
  0x10   :  { %19 = dma.hbm_to_vmem [thread:$0]  %s289_s1, 1024, %s17_s10, [#allocation5]  }
  0x11   :  { %222 = dma.done.wait [#allocation5], 1024  }
  0x12   :  { %223 = vsyncadd [#allocation5], 4294966272  ;;  %v23_v0 = vlaneseq  ;;  %s47_s23 = smul.u32 2654435769, %s288_s0  ;;  %v129_v16 = vld [vmem:[#allocation4] sm:$0xff]  ;;  %v130_v17 = vld [vmem:[#allocation4 + $0x8] sm:$0xff] }
  0x13   :  { %v131_v18 = vld [vmem:[#allocation4 + $0x10] sm:$0xff]  ;;  %v258_v23 = vmul.f32 2.0, %v129_v16  ;;  %v132_v25 = vld [vmem:[#allocation4 + $0x18] sm:$0xff]  ;;  %v133_v26 = vld [vmem:[#allocation4 + $0x20] sm:$0xff]  ;;  %v260_v28 = vmul.f32 2.0, %v130_v17  ;;  %s227_s0 = smov [#allocation7]  }
  0x14   :  { %v24_v1 = vshrl.u32 %v23_v0, 7  ;;  %v26_v2 = vand.u32 127, %v23_v0  ;;  %v48_v3 = vstv %s47_s23  ;;  %v262_v30 = vmul.f32 2.0, %v131_v18  ;;  %v134_v36 = vld [vmem:[#allocation4 + $0x28] sm:$0xff]  ;;  %s167_s1 = sshll.u32 %s227_s0, 4  ;;  %s168_s1 = int_to_ptr.vmem [resolvable:$true] %s167_s1 }
  0x15   :  { %v264_v34 = vmul.f32 2.0, %v132_v25  ;;  %v266_v39 = vmul.f32 2.0, %v133_v26  ;;  %v268_v48 = vmul.f32 2.0, %v134_v36  ;;  %s200_s24 = scalar_lea.vmem %s168_s1, 1024  ;;  %p205_p9 = scmp.lt.s32.totalorder %s168_s1, %s168_s1 }
  0x16   :  { %v37_v4 = vshll.u32 %v24_v1, 10  ;;  %v27_v5 = vadd.s32 128, %v26_v2  ;;  %v28_v6 = vadd.s32 256, %v26_v2  ;;  %v29_v7 = vadd.s32 384, %v26_v2  ;;  %p201_p8 = scmp.ne.s32.totalorder %s168_s1, %s200_s24  ;;  %p206_p10 = scmp.lt.s32.totalorder %s200_s24, %s200_s24 }
  0x17   :  { %v30_v8 = vadd.s32 512, %v26_v2  ;;  %v31_v9 = vadd.s32 640, %v26_v2  ;;  %v32_v10 = vadd.s32 768, %v26_v2  ;;  %v33_v11 = vadd.s32 896, %v26_v2 }
  0x18   :  { %v38_v12 = vor.u32 %v37_v4, %v26_v2  ;;  %v39_v13 = vor.u32 %v37_v4, %v27_v5  ;;  %v40_v14 = vor.u32 %v37_v4, %v28_v6  ;;  %v41_v15 = vor.u32 %v37_v4, %v29_v7  ;;  %v135_v6 = vld [vmem:[#allocation4 + $0x30] sm:$0xff]  ;;  %p207_p11 = por %p206_p10, %p205_p9 }
  0x19   :  { %v42_v19 = vor.u32 %v37_v4, %v30_v8  ;;  %v43_v20 = vor.u32 %v37_v4, %v31_v9  ;;  %v44_v21 = vor.u32 %v37_v4, %v32_v10  ;;  %v45_v27 = vor.u32 %v37_v4, %v33_v11 }
  0x1a   :  { %v49_v22 = vxor.u32 %v48_v3, %v38_v12  ;;  %v50_v24 = vxor.u32 %v48_v3, %v39_v13  ;;  %v51_v29 = vxor.u32 %v48_v3, %v40_v14  ;;  %v52_v31 = vxor.u32 %v48_v3, %v41_v15  ;;  %p208_p12 = pnand %p207_p11, %p201_p8 }
  0x1b   :  { %v53_v35 = vxor.u32 %v48_v3, %v42_v19  ;;  %v54_v40 = vxor.u32 %v48_v3, %v43_v20  ;;  %v55_v44 = vxor.u32 %v48_v3, %v44_v21  ;;  %v56_v56 = vxor.u32 %v48_v3, %v45_v27 }
  0x1c   :  { %v57_v32 = vshrl.u32 %v49_v22, 16  ;;  %v58_v33 = vshrl.u32 %v50_v24, 16  ;;  %v59_v37 = vshrl.u32 %v51_v29, 16  ;;  %v60_v38 = vshrl.u32 %v52_v31, 16 }
  0x1d   :  { %v61_v43 = vshrl.u32 %v53_v35, 16  ;;  %v62_v47 = vshrl.u32 %v54_v40, 16  ;;  %v63_v52 = vshrl.u32 %v55_v44, 16  ;;  %v64_v0 = vshrl.u32 %v56_v56, 16 }
  0x1e   :  { %v65_v41 = vxor.u32 %v57_v32, %v49_v22  ;;  %v66_v42 = vxor.u32 %v58_v33, %v50_v24  ;;  %v67_v45 = vxor.u32 %v59_v37, %v51_v29  ;;  %v68_v46 = vxor.u32 %v60_v38, %v52_v31 }
  0x1f   :  { %v69_v51 = vxor.u32 %v61_v43, %v53_v35  ;;  %v70_v55 = vxor.u32 %v62_v47, %v54_v40  ;;  %v71_v60 = vxor.u32 %v63_v52, %v55_v44  ;;  %v72_v10 = vxor.u32 %v64_v0, %v56_v56 }
  0x20   :  { %v73_v49 = vmul.u32 2246822507, %v65_v41  ;;  %v74_v50 = vmul.u32 2246822507, %v66_v42  ;;  %v143_v17 = vmul.f32 2.0, %v135_v6 }
  0x21   :  { %v75_v53 = vmul.u32 2246822507, %v67_v45  ;;  %v76_v54 = vmul.u32 2246822507, %v68_v46 }
  0x22   :  { %v81_v57 = vshrl.u32 %v73_v49, 13  ;;  %v82_v58 = vshrl.u32 %v74_v50, 13  ;;  %v77_v59 = vmul.u32 2246822507, %v69_v51  ;;  %v78_v63 = vmul.u32 2246822507, %v70_v55 }
  0x23   :  { %v83_v61 = vshrl.u32 %v75_v53, 13  ;;  %v84_v62 = vshrl.u32 %v76_v54, 13  ;;  %v79_v5 = vmul.u32 2246822507, %v71_v60  ;;  %v80_v26 = vmul.u32 2246822507, %v72_v10 }
  0x24   :  { %v89_v1 = vxor.u32 %v81_v57, %v73_v49  ;;  %v90_v2 = vxor.u32 %v82_v58, %v74_v50  ;;  %v85_v4 = vshrl.u32 %v77_v59, 13  ;;  %v86_v9 = vshrl.u32 %v78_v63, 13  ;;  %v136_v50 = vld [vmem:[#allocation4 + $0x38] sm:$0xff] }
  0x25   :  { %v91_v7 = vxor.u32 %v83_v61, %v75_v53  ;;  %v92_v8 = vxor.u32 %v84_v62, %v76_v54  ;;  %v87_v13 = vshrl.u32 %v79_v5, 13  ;;  %v88_v37 = vshrl.u32 %v80_v26, 13 }
  0x26   :  { %v97_v11 = vmul.u32 3266489909, %v89_v1  ;;  %v98_v12 = vmul.u32 3266489909, %v90_v2  ;;  %v93_v3 = vxor.u32 %v85_v4, %v77_v59  ;;  %v94_v16 = vxor.u32 %v86_v9, %v78_v63 }
  0x27   :  { %v99_v14 = vmul.u32 3266489909, %v91_v7  ;;  %v100_v15 = vmul.u32 3266489909, %v92_v8  ;;  %v95_v21 = vxor.u32 %v87_v13, %v79_v5  ;;  %v96_v49 = vxor.u32 %v88_v37, %v80_v26 }
  0x28   :  { %v105_v18 = vshrl.u32 %v97_v11, 16  ;;  %v106_v19 = vshrl.u32 %v98_v12, 16  ;;  %v101_v20 = vmul.u32 3266489909, %v93_v3  ;;  %v102_v25 = vmul.u32 3266489909, %v94_v16 }
  0x29   :  { %v107_v22 = vshrl.u32 %v99_v14, 16  ;;  %v108_v24 = vshrl.u32 %v100_v15, 16  ;;  %v103_v32 = vmul.u32 3266489909, %v95_v21 }
  0x2a   :  { %v113_v27 = vxor.u32 %v105_v18, %v97_v11  ;;  %v114_v29 = vxor.u32 %v106_v19, %v98_v12  ;;  %v109_v31 = vshrl.u32 %v101_v20, 16  ;;  %v110_v36 = vshrl.u32 %v102_v25, 16 }
  0x2b   :  { %v115_v33 = vxor.u32 %v107_v22, %v99_v14  ;;  %v116_v35 = vxor.u32 %v108_v24, %v100_v15  ;;  %v111_v40 = vshrl.u32 %v103_v32, 16 }
  0x2c   :  { %vm121_vm0 = vcmp.lt.u32.totalorder %v113_v27, 2147483648  ;;  %vm122_vm1 = vcmp.lt.u32.totalorder %v114_v29, 2147483648  ;;  %v117_v38 = vxor.u32 %v109_v31, %v101_v20  ;;  %v118_v45 = vxor.u32 %v110_v36, %v102_v25 }
  0x2d   :  { %v145_v41 = vsel %vm121_vm0, %v258_v23, 0.0  ;;  %v146_v42 = vsel %vm122_vm1, %v260_v28, 0.0  ;;  %vm123_vm2 = vcmp.lt.u32.totalorder %v115_v33, 2147483648  ;;  %vm124_vm3 = vcmp.lt.u32.totalorder %v116_v35, 2147483648 }
  0x2e   :  { %153 = vst [vmem:[#allocation7] sm:$0xff] %v145_v41  ;;  %154 = vst [vmem:[#allocation7 + $0x8] sm:$0xff] %v146_v42  ;;  %v147_v43 = vsel %vm123_vm2, %v262_v30, 0.0  ;;  %v148_v44 = vsel %vm124_vm3, %v264_v34, 0.0  ;;  %vm125_vm4 = vcmp.lt.u32.totalorder %v117_v38, 2147483648  ;;  %v119_v47 = vxor.u32 %v111_v40, %v103_v32 }
  0x2f   :  { %155 = vst [vmem:[#allocation7 + $0x10] sm:$0xff] %v147_v43  ;;  %156 = vst [vmem:[#allocation7 + $0x18] sm:$0xff] %v148_v44  ;;  %v149_v46 = vsel %vm125_vm4, %v266_v39, 0.0  ;;  %vm126_vm5 = vcmp.lt.u32.totalorder %v118_v45, 2147483648  ;;  %v104_v28 = vmul.u32 3266489909, %v96_v49 }
  0x30   :  { %157 = vst [vmem:[#allocation7 + $0x20] sm:$0xff] %v149_v46  ;;  %v150_v23 = vsel %vm126_vm5, %v268_v48, 0.0  ;;  %vm127_vm6 = vcmp.lt.u32.totalorder %v119_v47, 2147483648  ;;  %v144_v34 = vmul.f32 2.0, %v136_v50 }
  0x31   :  { %158 = vst [vmem:[#allocation7 + $0x28] sm:$0xff] %v150_v23  ;;  %v151_v51 = vsel %vm127_vm6, %v143_v17, 0.0  ;;  %v112_v30 = vshrl.u32 %v104_v28, 16 }
  0x32   :  { %159 = vst [vmem:[#allocation7 + $0x30] sm:$0xff] %v151_v51 }
  0x33   :  { %v120_v52 = vxor.u32 %v112_v30, %v104_v28 }
  0x35   :  { %vm128_vm7 = vcmp.lt.u32.totalorder %v120_v52, 2147483648 }
  0x36   :  { %v152_v39 = vsel %vm128_vm7, %v144_v34, 0.0 }
  0x37   :  { %160 = vst [vmem:[#allocation7 + $0x38] sm:$0xff] %v152_v39 }
  0x38   :  { %211 = shalt.err (!%p208_p12)
}
  0x39   :  { %s212_s27 = scalar_lea.hbm %s290_s2, 1024 }
  0x3a   :  { %p213_p13 = scmp.ne.s32.totalorder %s290_s2, %s212_s27  ;;  %p216_p0 = scmp.lt.u32.totalorder %s212_s27, %s290_s2 }
  0x3c   :  { %p218_p1 = pnand %p216_p0, %p213_p13 }
  0x3e   :  { %221 = shalt.err (!%p218_p1)
}
  0x3f   :  { %170 = dma.vmem_to_hbm [thread:$0]  %s168_s1, 1024, %s290_s2, [#allocation6]  }
  0x40   :  { %224 = dma.done.wait [#allocation6], 1024  }
  0x41   :  { %225 = vsyncadd [#allocation6], 4294966272 }
  0x42   :  { %174 = vsyncpa [#allocation5], 1 }
  0x43   :  { %175 = vsyncpa [#allocation6], 1 }

</bundles_post_ra>
